<compile_context>
chip_gen: v7x
topology: tpu7x:2x2x1
jax: 0.10.0
libtpu: 0.0.40
codegen_flags: <defaults>
</compile_context>

<pallas_src>
import jax
import jax.numpy as jnp
from jax.experimental import pallas as pl
from jax.experimental.pallas import tpu as pltpu


def _round_up(x, m):
    return (x + m - 1) // m * m


def _pick_row_tile(n_rows, max_tile=256):
    """Largest 8-aligned row tile <= max_tile; partial last block is fine."""
    if n_rows >= max_tile:
        return max_tile
    if n_rows >= 8:
        return (n_rows // 8) * 8
    return n_rows  # tiny sequence: block == full row extent


def _patch_embed_kernel(patches_ref, w_ref, posbias_ref, out_ref):
    # patches_ref: (TM, Kp) bf16  row 0 of the global array is a zero row
    #                             standing in for the cls token.
    # w_ref:       (Kp, Dp) bf16  conv weight as a matmul; constant index_map
    #                             -> resident, DMA'd once.
    # posbias_ref: (TM, Dp) bf16  row 0: cls_emb + pos[0]; rows i>0:
    #                             pos[i] + conv_bias.
    # out_ref:     (TM, Dp)       full token tile (cls + patch tokens).
    acc = jnp.dot(patches_ref[...], w_ref[...],
                  preferred_element_type=jnp.float32)
    out_ref[...] = (acc + posbias_ref[...].astype(jnp.float32)).astype(out_ref.dtype)


def patch_embedding_forward(images, conv_w, conv_b, cls_emb, pos_emb,
                            patch_size, *, row_tile=256,
                            out_dtype=jnp.bfloat16):
    """images: (B, C, H, W) -> (B, 1 + (H/P)*(W/P), D) tokens in out_dtype."""
    B, C, H, W = images.shape
    P = patch_size
    D = conv_w.shape[0]
    Hp, Wp = H // P, W // P
    Lp = Hp * Wp
    L = Lp + 1                     # +1 cls token, handled inside the kernel
    K = C * P * P

    Kp = _round_up(K, 128)         # contraction lane dim (128-granular)
    Dp = _round_up(D, 128)         # lane-dense stores; == D for prod hiddens
    TM = _pick_row_tile(L, row_tile)
    n_row_tiles = pl.cdiv(L, TM)

    # ---- glue: im2col in (c, p, q) order matching the OIHW weight layout ----
    x = images.astype(jnp.bfloat16).reshape(B, C, Hp, P, Wp, P)
    x = x.transpose(0, 2, 4, 1, 3, 5).reshape(B, Lp, K)      # (B, Lp, K)
    patches = jnp.pad(x, ((0, 0), (1, 0), (0, Kp - K)))      # (B, L, Kp); row 0 = cls slot

    # conv weight (D, C, P, P) -> (K, D) so that patches @ w_mat == strided conv
    w_mat = jnp.pad(conv_w.reshape(D, K).T.astype(jnp.bfloat16),
                    ((0, Kp - K), (0, Dp - D)))

    # pos table with conv bias folded in; row 0 carries the cls token
    # (cls_emb + pos[0], NO conv bias), matching the reference module.
    cls_row = cls_emb.astype(jnp.float32) + pos_emb[0:1].astype(jnp.float32)
    tok_rows = pos_emb[1:L].astype(jnp.float32) + conv_b.astype(jnp.float32)[None, :]
    posbias = jnp.concatenate([cls_row, tok_rows], axis=0)            # (L, D)
    posbias = jnp.pad(posbias, ((0, 0), (0, Dp - D))).astype(jnp.bfloat16)

    out = pl.pallas_call(
        _patch_embed_kernel,
        out_shape=jax.ShapeDtypeStruct((B, L, Dp), out_dtype),
        grid_spec=pltpu.PrefetchScalarGridSpec(
            num_scalar_prefetch=0,
            # batch innermost: posbias block index constant over the inner loop
            grid=(n_row_tiles, B),
            in_specs=[
                pl.BlockSpec((pl.Squeezed(), TM, Kp), lambda m, b: (b, m, 0)),
                pl.BlockSpec((Kp, Dp), lambda m, b: (0, 0)),   # resident weight
                pl.BlockSpec((TM, Dp), lambda m, b: (m, 0)),   # once per row tile
            ],
            out_specs=pl.BlockSpec((pl.Squeezed(), TM, Dp),
                                   lambda m, b: (b, m, 0)),
        ),
        compiler_params=pltpu.CompilerParams(
            dimension_semantics=("parallel", "parallel"),
            vmem_limit_bytes=32 * 1024 * 1024,
            # let XLA fuse the patch-extraction transpose/pad into the input DMA
            allow_input_fusion=[True, False, False],
        ),
    )(patches, w_mat, posbias)

    if Dp != D:  # no-op (elided by XLA) for production hidden sizes, D % 128 == 0
        out = out[..., :D]
    return out


def _reference(images, conv_w, conv_b, cls_emb, pos_emb, patch_size):
    # pure-f32 reference, faithful to the PyTorch module
    y = jax.lax.conv_general_dilated(
        images, conv_w,
        window_strides=(patch_size, patch_size), padding="VALID",
        dimension_numbers=("NCHW", "OIHW", "NCHW"),
    ) + conv_b[None, :, None, None]
    B, D, Hp, Wp = y.shape
    y = y.reshape(B, D, Hp * Wp).transpose(0, 2, 1)           # (B, Lp, D)
    cls = jnp.broadcast_to(cls_emb[None, :, :], (B, 1, D))
    y = jnp.concatenate([cls, y], axis=1)
    return y + pos_emb[None, :, :]


if __name__ == "__main__":
    # small config consistent with the module
    B, C, H, W = 2, 4, 16, 16
    patch_size = 4
    hidden = 32
    Lp = (H // patch_size) * (W // patch_size)
    num_positions = Lp + 1

    key = jax.random.PRNGKey(0)
    k_img, k_w, k_b, k_cls, k_pos = jax.random.split(key, 5)

    images = jax.random.normal(k_img, (B, C, H, W), dtype=jnp.float32)
    conv_w = jax.random.normal(
        k_w, (hidden, C, patch_size, patch_size), dtype=jnp.float32) * 0.02
    conv_b = jax.random.normal(k_b, (hidden,), dtype=jnp.float32) * 0.02
    cls_emb = jax.random.normal(k_cls, (1, hidden), dtype=jnp.float32) * 0.02
    pos_emb = jax.random.normal(
        k_pos, (num_positions, hidden), dtype=jnp.float32) * 0.02

    fwd = jax.jit(patch_embedding_forward, static_argnames=("patch_size",))
    out = jax.block_until_ready(
        fwd(images, conv_w, conv_b, cls_emb, pos_emb, patch_size=patch_size))

    ref = _reference(images, conv_w, conv_b, cls_emb, pos_emb, patch_size)
    assert out.shape == (B, num_positions, hidden), out.shape
    assert out.dtype == jnp.bfloat16, out.dtype
    err = float(jnp.max(jnp.abs(out.astype(jnp.float32) - ref)))
    assert err < 2e-2, err

    print("KERNEL_OK")
</pallas_src>

<mosaic_0001>
module attributes {stable_mosaic.version = 11 : i64} {
  func.func @_patch_embed_kernel(%arg0: i32, %arg1: i32, %arg2: memref<1x16x128xbf16, #tpu.memory_space<vmem>>, %arg3: memref<128x128xbf16, #tpu.memory_space<vmem>>, %arg4: memref<16x128xbf16, #tpu.memory_space<vmem>>, %arg5: memref<1x16x128xbf16, #tpu.memory_space<vmem>>) attributes {dimension_semantics = [#tpu.dimension_semantics<parallel>, #tpu.dimension_semantics<parallel>], iteration_bounds = array<i64: 2, 2>, scalar_prefetch = 0 : i64, scratch_operands = 0 : i64, tpu.core_type = #tpu.core_type<tc>, window_params = [{transform_indices = @transform_0, window_bounds = array<i64: 1, 16, 128>}, {pipeline_mode = #tpu.pipeline_mode<synchronous>, transform_indices = @transform_1, window_bounds = array<i64: 128, 128>}, {transform_indices = @transform_2, window_bounds = array<i64: 16, 128>}, {transform_indices = @transform_3, window_bounds = array<i64: 1, 16, 128>}]} {
    %c0 = arith.constant 0 : index
    %c0_0 = arith.constant 0 : index
    %c0_1 = arith.constant 0 : index
    %0 = vector.load %arg2[%c0, %c0_0, %c0_1] : memref<1x16x128xbf16, #tpu.memory_space<vmem>>, vector<1x16x128xbf16>
    %1 = vector.shape_cast %0 : vector<1x16x128xbf16> to vector<16x128xbf16>
    %c0_2 = arith.constant 0 : index
    %c0_3 = arith.constant 0 : index
    %2 = vector.load %arg3[%c0_2, %c0_3] : memref<128x128xbf16, #tpu.memory_space<vmem>>, vector<128x128xbf16>
    %cst = arith.constant dense<0.000000e+00> : vector<16x128xf32>
    %3 = tpu.matmul %1, %2, %cst {dimension_numbers = #tpu.dot_dimension_numbers<[1], [0], [0], [1], [0, 0, 1, 1], [], []>} : vector<16x128xbf16>, vector<128x128xbf16>, vector<16x128xf32> -> vector<16x128xf32>
    %c0_4 = arith.constant 0 : index
    %c0_5 = arith.constant 0 : index
    %4 = vector.load %arg4[%c0_4, %c0_5] : memref<16x128xbf16, #tpu.memory_space<vmem>>, vector<16x128xbf16>
    %5 = arith.extf %4 : vector<16x128xbf16> to vector<16x128xf32>
    %6 = arith.addf %3, %5 : vector<16x128xf32>
    %7 = arith.truncf %6 : vector<16x128xf32> to vector<16x128xbf16>
    %c0_6 = arith.constant 0 : index
    %c0_7 = arith.constant 0 : index
    %c0_8 = arith.constant 0 : index
    %8 = vector.load %arg5[%c0_6, %c0_7, %c0_8] : memref<1x16x128xbf16, #tpu.memory_space<vmem>>, vector<1x16x128xbf16>
    %9 = vector.shape_cast %8 : vector<1x16x128xbf16> to vector<16x128xbf16>
    %10 = vector.shape_cast %7 : vector<16x128xbf16> to vector<1x16x128xbf16>
    tpu.vector_store %arg5[%c0_6, %c0_7, %c0_8], %10 {strides = array<i32>} : memref<1x16x128xbf16, #tpu.memory_space<vmem>>, vector<1x16x128xbf16>,
    return
  }
  func.func @transform_0(%arg0: i32, %arg1: i32) -> (i32, i32, i32) {
    %c0_i32 = arith.constant 0 : i32
    %c0_i32_0 = arith.constant 0 : i32
    return %arg1, %arg0, %c0_i32 : i32, i32, i32
  }
  func.func @transform_1(%arg0: i32, %arg1: i32) -> (i32, i32) {
    %c0_i32 = arith.constant 0 : i32
    %c0_i32_0 = arith.constant 0 : i32
    %c0_i32_1 = arith.constant 0 : i32
    return %c0_i32, %c0_i32_0 : i32, i32
  }
  func.func @transform_2(%arg0: i32, %arg1: i32) -> (i32, i32) {
    %c0_i32 = arith.constant 0 : i32
    %c0_i32_0 = arith.constant 0 : i32
    return %arg0, %c0_i32 : i32, i32
  }
  func.func @transform_3(%arg0: i32, %arg1: i32) -> (i32, i32, i32) {
    %c0_i32 = arith.constant 0 : i32
    %c0_i32_0 = arith.constant 0 : i32
    return %arg1, %arg0, %c0_i32 : i32, i32, i32
  }
}

</mosaic_0001>

<bundles_post_ra>
// kernel: patch_embedding_forward.2
= control target key start
LH: loop header
LB: loop body
LE: loop exit
PB: predicated region body
PF: predicated region fallthrough
CT: control target
= control target key end

     0   :  { %s1336_s0 = inlined_call_operand.vmem [shape: bf16[128,128], index: 0, kind: input, shape index: {}]   ;;  %s1337_s1 = inlined_call_operand.vmem [shape: bf16[17,128], index: 1, kind: input, shape index: {}]   ;;  %s1338_s2 = inlined_call_operand.vmem [shape: bf16[2,16,64], index: 2, kind: input, shape index: {}]   ;;  %s1339_s3 = inlined_call_operand.<no memory space> [shape: bf16[], index: 3, kind: input, shape index: {}]   ;;  %s1340_s4 = inlined_call_operand.vmem [shape: bf16[2,17,128], index: 4, kind: output, shape index: {}]  }
   0x1   :  { %v9_v0 = vstv %s1339_s3 }
   0x2   :  { %v1137_v1 = vunpack.i.l.bf16 %v9_v0 }
   0x3   :  { %s1139_s17 = smov 0   ;;  %s1141_s18 = smov 0  }
   0x4   :  { %s1143_s19 = smov 0   ;;  %s1145_s20 = smov 0  }
   0x5   :  { %s1147_s21 = smov 0   ;;  %s1149_s22 = smov 0  }
   0x6   :  { %s1151_s23 = smov 0  }
   0x7 LB: > { %s28_s3 = sadd.s32 1, %s1065_s21  ;;  %s31_s24 = sadd.s32 1, %s1069_s22  ;;  %s1073_s23 = sphi %s1151_s23, %s19_s23   ;;  %s1069_s22 = sphi %s1149_s22, %s1353_s22   ;;  %s1065_s21 = sphi %s1147_s21, %s1352_s21   ;;  %s1061_s20 = sphi %s1145_s20, %s1351_s20   ;;  %s1057_s19 = sphi %s1143_s19, %s1350_s19   ;;  %s1053_s18 = sphi %s1141_s18, %s1349_s18   ;;  %s1049_s17 = sphi %s1139_s17, %s1348_s17  }
   0x8   : > { %p29_p0 = scmp.ge.s32.totalorder %s28_s3, 2  ;;  %s764_s25 = sadd.s32 4294967295, %s1073_s23  }
   0x9   : > { %p125_p1 = scmp.ne.s32.totalorder %s1053_s18, %s1049_s17  ;;  %p126_p2 = scmp.eq.s32.totalorder %s764_s25, 3 }
   0xa   : > { %s1355_s3 = smov (%p29_p0, %s28_s3), 0  ;;  %s1357_s24 = smov (!%p29_p0, %s31_s24), %s1069_s22 }
   0xb   : > { %1343 = sst [smem:[#allocation9_spill]] %s1355_s3  ;;  %s110_s26 = ssub.s32 %s1065_s21, %s1355_s3 }
   0xc   : > { %p33_p3 = scmp.ge.s32.totalorder %s1357_s24, 2  ;;  %p768_p4 = scmp.ge.s32.totalorder %s1073_s23, 1 }
   0xd   : > { %p1185_p5 = por %p126_p2, %p125_p1  ;;  %p196_p6 = scmp.lt.s32.totalorder %s1073_s23, 5 }
   0xe   : > { %s1359_s24 = smov (%p33_p3, %s1357_s24), 0  ;;  %s115_s30 = sadd.s32 1, %s1053_s18 }
   0xf   : > { %1345 = sst [smem:[#allocation10_spill]] %s1359_s24  ;;  %p197_p7 = pnand %p768_p4, %p196_p6 }
  0x10   : > { %s111_s28 = ssub.s32 %s1069_s22, %s1359_s24 }
  0x11   : > { %s112_s29 = sor.u32 %s111_s28, %s110_s26  ;;  %200 = sbr.rel (%p197_p7) target bundleno = 341 (0x155), region = 32 }
  0x12   : > { %p113_p8 = scmp.eq.s32.totalorder %s112_s29, 0 }
  0x14   : > { %s1196_s5 = scalar_select %p113_p8, %s1053_s18, %s115_s30  }
  0x18   : > { %v978_v2 = vld [vmem:[%s1336_s0] sm:$0xff]   ;;  %v1107_v3 = vmov 0.0   ;;  %v979_v4 = vld [vmem:[%s1336_s0 + $0x8] sm:$0xff]   ;;  %vm1108_vm0 = vmmov 0   ;;  %s1207_s10 = sshll.u32 %s1061_s20, 1  ;;  %p246_p9 = scmp.lt.s32.totalorder %s1057_s19, 1  ;;  %v304_v11 = vlaneseq }
  0x19   : > { %835 = vmatprep.subr.bf16.mxu0 %v1107_v3  ;;  %851 = vmatprep.mubr.msk.bf16.mxu0 %vm1108_vm0, %v1107_v3  ;;  %s771_s11 = sadd.s32 4294967295, %s1207_s10  ;;  %v980_v5 = vld [vmem:[%s1336_s0 + $0x10] sm:$0xff]   ;;  %s282_s20 = ssub.s32 2, %s1207_s10  ;;  %v981_v6 = vld [vmem:[%s1336_s0 + $0x18] sm:$0xff]   ;;  %v982_v7 = vld [vmem:[%s1336_s0 + $0x20] sm:$0xff]   ;;  %vm340_vm5 = vcmask 1046528  }
  0x1a   : > { %836 = vmatpush3.bf16.msra.mxu0 %v978_v2  ;;  %s247_s12 = scalar_select %p246_p9, %s1057_s19, 1  ;;  %v983_v8 = vld [vmem:[%s1336_s0 + $0x28] sm:$0xff]   ;;  %v984_v9 = vld [vmem:[%s1336_s0 + $0x30] sm:$0xff]   ;;  %v985_v10 = vld [vmem:[%s1336_s0 + $0x38] sm:$0xff]   ;;  %v305_v15 = vand.u32 127, %v304_v11 }
  0x1b   : > { %837 = vmatprep.subr.bf16.mxu0 %v1107_v3  ;;  %p249_p10 = scmp.lt.s32.totalorder %s771_s11, 1  ;;  %s310_s25 = sadd.s32 1, %s1207_s10 }
  0x1c   : > { %s772_s15 = sshll.u32 %s247_s12, 1  ;;  %s1222_s29 = sor.u32 %s771_s11, %s282_s20  ;;  %vm307_vm2 = vcmp.lt.s32.totalorder %v305_v15, 64 }
  0x1d   : > { %s250_s16 = scalar_select %p249_p10, %s771_s11, 1  ;;  %v301_v13 = vstv %s1222_s29 }
  0x1e   : > { %838 = vmatpush3.bf16.msra.mxu0 %v979_v4  ;;  %p284_p11 = scmp.lt.s32.totalorder %s1222_s29, 0  ;;  %s779_s6 = sadd.s32 4294967295, %s310_s25  ;;  %vm302_vm1 = vcmp.lt.s32.totalorder %v301_v13, 0 }
  0x1f   : > { %839 = vmatprep.subr.bf16.mxu0 %v1107_v3  ;;  %s1226_s30 = sadd.s32 %s772_s15, %s250_s16  ;;  %s312_s12 = ssub.s32 2, %s310_s25 }
  0x20   : > { %s285_s7 = scalar_select %p284_p11, 0, 255 }
  0x21   : > { %s347_s13 = sadd.s32 2, %s1207_s10  ;;  %s773_s11 = sshll.u32 %s1226_s30, 2 }
  0x22   : > { %840 = vmatpush3.bf16.msra.mxu0 %v980_v5  ;;  %s286_s14 = sshrl.u32 %s285_s7, 1  ;;  %s1234_s26 = sor.u32 %s779_s6, %s312_s12 }
  0x23   : > { %841 = vmatprep.subr.bf16.mxu0 %v1107_v3  ;;  %s287_s20 = sor.u32 %s286_s14, %s285_s7  ;;  %s782_s16 = sadd.s32 4294967295, %s347_s13  ;;  %v332_v16 = vstv %s1234_s26 }
  0x24   : > { %s288_s15 = sand.u32 85, %s287_s20  ;;  %s349_s8 = ssub.s32 2, %s347_s13  ;;  %vm333_vm3 = vcmp.lt.s32.totalorder %v332_v16, 0 }
  0x25   : > { %s289_s3 = sshrl.u32 %s288_s15, 1  ;;  %s1240_s9 = sor.u32 %s782_s16, %s349_s8 }
  0x26   : > { %842 = vmatpush3.bf16.msra.mxu0 %v981_v6  ;;  %s290_s25 = sor.u32 %s289_s3, %s288_s15  ;;  %p314_p12 = scmp.lt.s32.totalorder %s1234_s26, 0  ;;  %v369_v17 = vstv %s1240_s9 }
  0x27   : > { %843 = vmatprep.subr.bf16.mxu0 %v1107_v3  ;;  %s291_s30 = sand.u32 51, %s290_s25  ;;  %p351_p13 = scmp.lt.s32.totalorder %s1240_s9, 0  ;;  %vm370_vm4 = vcmp.lt.s32.totalorder %v369_v17, 0 }
  0x28   : > { %s292_s6 = sshrl.u32 %s291_s30, 2  ;;  %s1251_s3 = scalar_lea.vmem %s1338_s2, %s773_s11 }
  0x29   : > { %s293_s24 = sor.u32 %s292_s6, %s291_s30  ;;  %p267_p0 = scmp.lt.s32.totalorder %s1207_s10, 2 }
  0x2a   : > { %844 = vmatpush3.bf16.msra.mxu0 %v982_v7  ;;  %s294_s20 = sand.u32 15, %s293_s24 }
  0x2b   : > { %845 = vmatprep.subr.bf16.mxu0 %v1107_v3  ;;  %s315_s15 = scalar_select %p314_p12, 0, 255  ;;  %v295_v12 = vld [vmem:[%s1251_s3] sm:%s294_s20] }
  0x2c   : > { %s352_s16 = scalar_select %p351_p13, 0, 255  ;;  %v296_v14 = vunpack.c.l.bf16 %v295_v12 }
  0x2d   : > { %s316_s25 = sshrl.u32 %s315_s15, 1 }
  0x2e   : > { %846 = vmatpush3.bf16.msra.mxu0 %v983_v8  ;;  %s317_s30 = sor.u32 %s316_s25, %s315_s15  ;;  %s353_s6 = sshrl.u32 %s352_s16, 1  ;;  %v303_v18 = vsel %vm302_vm1, %v1137_v1, %v296_v14 }
  0x2f   : > { %847 = vmatprep.subr.bf16.mxu0 %v1107_v3  ;;  %s318_s11 = sand.u32 85, %s317_s30  ;;  %s354_s7 = sor.u32 %s353_s6, %s352_s16  ;;  %v308_v22 = vsel %vm307_vm2, %v303_v18, %v1137_v1 }
  0x30   : > { %s319_s12 = sshrl.u32 %s318_s11, 1  ;;  %s355_s24 = sand.u32 85, %s354_s7 }
  0x31   : > { %s320_s13 = sor.u32 %s319_s12, %s318_s11  ;;  %s356_s14 = sshrl.u32 %s355_s24, 1 }
  0x32   : > { %848 = vmatpush3.bf16.msra.mxu0 %v984_v9  ;;  %s321_s28 = sand.u32 51, %s320_s13  ;;  %s357_s8 = sor.u32 %s356_s14, %s355_s24 }
  0x33   : > { %849 = vmatprep.subr.bf16.mxu0 %v1107_v3  ;;  %s322_s20 = sshrl.u32 %s321_s28, 2  ;;  %s358_s15 = sand.u32 51, %s357_s8 }
  0x34   : > { %s323_s25 = sor.u32 %s322_s20, %s321_s28  ;;  %s359_s29 = sshrl.u32 %s358_s15, 2 }
  0x35   : > { %s324_s16 = sand.u32 15, %s323_s25  ;;  %s360_s30 = sor.u32 %s359_s29, %s358_s15 }
  0x36   : > { %850 = vmatpush3.bf16.msra.mxu0 %v985_v10  ;;  %v780_v19 = vld [vmem:[%s1251_s3 + $0x4] sm:%s324_s16]  ;;  %s361_s6 = sand.u32 15, %s360_s30  ;;  %s236_s12 = sand.u32 1, %s1049_s17  }
  0x37   : > { %v326_v20 = vunpack.c.l.bf16 %v780_v19  ;;  %v783_v21 = vld [vmem:[%s1251_s3 + $0x8] sm:%s361_s6]  ;;  %s268_s26 = scalar_select %p267_p0, %s1207_s10, 2 }
  0x38   : > { %v363_v23 = vunpack.c.l.bf16 %v783_v21  ;;  %s769_s24 = sshll.u32 %s236_s12, 3  ;;  %s520_s17 = ssub.s32 (%p1185_p5), 3, %s1207_s10 }
  0x39   : > { %v334_v24 = vsel %vm333_vm3, %v1137_v1, %v326_v20  ;;  %s776_s9 = sshll.u32 %s268_s26, 2  ;;  %s1280_s13 = scalar_lea.vmem [#allocation7], %s769_s24  }
  0x3a   : > { %v339_v25 = vsel %vm307_vm2, %v334_v24, %v1137_v1  ;;  %v371_v26 = vsel %vm370_vm4, %v1137_v1, %v363_v23  ;;  %s270_s7 = scalar_lea.vmem %s1337_s1, %s776_s9  ;;  %s855_s14 = smul.u32 (%p1185_p5), 3, %s1057_s19 }
  0x3b   : > { %v341_v27 = vsel %vm340_vm5, %v339_v25, %v308_v22  ;;  %v376_v28 = vsel %vm307_vm2, %v371_v26, %v1137_v1  ;;  %v818_v35 = vld [vmem:[%s270_s7] sm:$0xff]   ;;  %p521_p1 = scmp.lt.s32.totalorder (%p1185_p5), %s520_s17, 2 }
  0x3c   : > { %v342_v29 = vrot.slane %v341_v27, 7  ;;  %v378_v30 = vsel %vm340_vm5, %v376_v28, %v339_v25  ;;  %v819_v36 = vunpack.c.l.bf16 %v818_v35  ;;  %v820_v37 = vunpack.c.h.bf16 %v818_v35  ;;  %s526_s28 = sadd.s32 (%p1185_p5), %s855_s14, %s1207_s10 }
  0x3d   : > { %v379_v31 = vrot.slane %v378_v30, 7  ;;  %s800_s8 = sshll.u32 (%p1185_p5), %s526_s28, 2 }
  0x3e   : > { %v343_v32 = vpack.c.bf16 %v1107_v3, %v342_v29  ;;  %s1294_s29 = scalar_lea.vmem (%p1185_p5), %s1340_s4, %s800_s8  }
  0x3f   : > { %v381_v33 = vpack.c.bf16 %v1107_v3, %v379_v31 }
  0x40   : > { %345 = vst [vmem:[#allocation8] sm:$0xf] %v343_v32 }
  0x41   : > { %383 = vst [vmem:[#allocation8 + $0x4] sm:$0xf] %v381_v33 }
  0x48   : > { %v986_v34 = vld [vmem:[#allocation8] sm:$0xff]  }
  0x49   : > { %852 = vmatmul.mubr.bf16.vlgmr.msra.gmra.mrb[0].mxu0 %v986_v34 }
 0x11c   : > { %v495_v38 = vpop.f32.mrb[0].mxu0 }
 0x11d   : > { %v496_v39 = vadd.f32 %v819_v36, %v495_v38  ;;  %v853_v40 = vpop.f32.mrb[1].mxu0  ;;  %518 = sbr.rel (!%p1185_p5) target bundleno = 341 (0x155), region = 36 }
 0x11e   : > { %v498_v41 = vpop.f32.mrb[2].mxu0 }
 0x11f   : > { %v499_v42 = vadd.f32 %v820_v37, %v498_v41  ;;  %v854_v43 = vpop.f32.mrb[3].mxu0 }
 0x121   : > { %v824_v44 = vpack.c.bf16 %v499_v42, %v496_v39 }
 0x123   : > { %825 = vst [vmem:[%s1280_s13] sm:$0xff] %v824_v44  }
 0x124   : > { %s1361_s17 = smov (!%p521_p1, %s520_s17), 2 }
 0x125   : > { %s798_s20 = sshll.u32 %s1361_s17, 6 }
 0x126   : > { %p801_p2 = scmp.eq.s32.totalorder %s798_s20, 0 }
 0x127   : > { %s1297_s27 = sshrl.u32 (!%p801_p2), %s1361_s17, 1 }
 0x128   : > { %531 = sbr.rel (%p801_p2) target bundleno = 341 (0x155), region = 40  ;;  %p802_p3 = scmp.le.s32.totalorder (!%p801_p2), %s1297_s27, 0 }
 0x12f   : > { %703 = sbr.rel (%p802_p3) target bundleno = 320 (0x140), region = 118  ;;  %s1075_s19 = smov (!%p802_p3), %s1294_s29  }
 0x130   : > { %s1079_s10 = smov (!%p802_p3), %s1280_s13   ;;  %s1083_s16 = smov (!%p802_p3), 0  }
 0x131   : > { %s1087_s30 = smov (!%p802_p3), 0  }
 0x136 LB: >> { %v547_v45 = vld [vmem:[%s1081_s10] sm:$0xf]  ;;  %v549_v46 = vld [vmem:[%s1081_s10 + $0x4] sm:$0xf]  ;;  %s551_s6 = sadd.s32 1, %s1085_s16  ;;  %s541_s30 = sadd.s32 1, %s1089_s30   ;;  %s1089_s30 = sphi %s1087_s30, %s541_s30   ;;  %s1085_s16 = sphi %s1083_s16, %s1084_s16   ;;  %s1081_s10 = sphi %s1079_s10, %s556_s10   ;;  %s1077_s19 = sphi %s1075_s19, %s557_s19  }
 0x137   : >> { %548 = vst [vmem:[%s1077_s19] sm:$0xf] %v547_v45  ;;  %550 = vst [vmem:[%s1077_s19 + $0x4] sm:$0xf] %v549_v46  ;;  %p552_p4 = scmp.ge.s32.totalorder %s551_s6, %s1297_s27  ;;  %p540_p5 = scmp.ge.s32.totalorder %s541_s30, %s1297_s27 }
 0x139   : >> { %s1363_s6 = smov (%p552_p4, %s551_s6), 0  ;;  %543 = sbr.rel (!%p540_p5) target bundleno = 310 (0x136), region = 124 }
 0x13a   : >> { %s803_s26 = sshll.u32 %s1363_s6, 3  ;;  %s1084_s16 = smov %s1363_s6  }
 0x13b   : >> { %s556_s10 = scalar_lea.vmem %s1280_s13, %s803_s26 [#allocation7]   ;;  %s557_s19 = scalar_lea.vmem %s1294_s29, %s803_s26  }
 0x140 PF: > { %s1307_s9 = sand.u32 1, %s1361_s17   ;;  %s815_s3 = sshll.u32 %s1297_s27, 3 }
 0x141   : > { %s562_s11 = scalar_lea.vmem %s1280_s13, %s815_s3 [#allocation7]   ;;  %s564_s7 = scalar_lea.vmem %s1294_s29, %s815_s3  }
 0x142   : > { %p808_p6 = scmp.le.s32.totalorder %s1307_s9, 0 }
 0x143   : > { %s1091_s12 = smov (!%p808_p6), %s564_s7   ;;  %s1095_s24 = smov (!%p808_p6), %s562_s11  }
 0x144   : > { %717 = sbr.rel (%p808_p6) target bundleno = 341 (0x155), region = 129  ;;  %s1099_s14 = smov (!%p808_p6), 0  }
 0x145   : > { %s1103_s28 = smov (!%p808_p6), 0  }
 0x14b LB: >> { %v574_v47 = vld [vmem:[%s1097_s24] sm:$0xf]  ;;  %s576_s17 = sadd.s32 1, %s1101_s14  ;;  %s568_s28 = sadd.s32 1, %s1105_s28   ;;  %s1105_s28 = sphi %s1103_s28, %s568_s28   ;;  %s1101_s14 = sphi %s1099_s14, %s1100_s14   ;;  %s1097_s24 = sphi %s1095_s24, %s581_s24   ;;  %s1093_s12 = sphi %s1091_s12, %s582_s12  }
 0x14c   : >> { %575 = vst [vmem:[%s1093_s12] sm:$0xf] %v574_v47  ;;  %p577_p7 = scmp.ge.s32.totalorder %s576_s17, %s1307_s9  ;;  %p567_p8 = scmp.ge.s32.totalorder %s568_s28, %s1307_s9 }
 0x14e   : >> { %s1365_s17 = smov (%p577_p7, %s576_s17), 0  ;;  %570 = sbr.rel (!%p567_p8) target bundleno = 331 (0x14b), region = 135 }
 0x14f   : >> { %s809_s13 = sshll.u32 %s1365_s17, 2  ;;  %s1100_s14 = smov %s1365_s17  }
 0x150   : >> { %s581_s24 = scalar_lea.vmem %s562_s11, %s809_s13 [#allocation7]   ;;  %s582_s12 = scalar_lea.vmem %s564_s7, %s809_s13  }
 0x155 PF: > { %s19_s23 = sadd.s32 1, %s1073_s23   ;;  %s1346_s8 = sld [smem:[#allocation9_spill]] }
 0x156   : > { %p16_p9 = scmp.ge.s32.totalorder %s19_s23, 6   ;;  %s1347_s15 = sld [smem:[#allocation10_spill]] }
 0x157   : > { %s1348_s17 = smov %s1053_s18  ;;  %s1349_s18 = smov %s1196_s5 }
 0x158   : > { %s1350_s19 = smov %s1065_s21  ;;  %s1351_s20 = smov %s1069_s22 }
 0x159   :  { %18 = sbr.rel (!%p16_p9) target bundleno = 7 (0x7), region = 146 }
 0x15b   : > { %s1352_s21 = smov %s1346_s8 }
 0x15c   : > { %s1353_s22 = smov %s1347_s15 }

</bundles_post_ra>
